<compile_context>
chip_gen: v5e
topology: v5e:2x2
jax: 0.10.0
libtpu: 0.0.40
codegen_flags: <defaults>
</compile_context>

<pallas_src>
import math
import functools

import jax
import jax.numpy as jnp
from jax.experimental import pallas as pl
from jax.experimental.pallas import tpu as pltpu


def _mha_block_kernel(
    # activations
    xq_ref, xkv_ref,
    # attention weights (bf16) / biases (f32)
    wq_ref, bq_ref, wk_ref, bk_ref, wv_ref, bv_ref, wo_ref, bo_ref,
    # layer-norm + FFN params
    gamma_ref, beta_ref, w1_ref, b1_ref, w2_ref, b2_ref,
    # output
    o_ref,
    # persistent per-batch K/V scratch, bf16 (S, D)
    k_scr, v_scr,
    *, num_heads, head_dim, kv_block, ln_eps):
    H, hd = num_heads, head_dim
    x_q = xq_ref[0]                               # (TQ, D) f32: query rows + residual input
    TQ, D = x_q.shape
    S = k_scr.shape[0]
    TK = kv_block
    n_kv = S // TK

    # --- K/V projection hoisted out of the query-tile loop: once per batch ---
    @pl.when(pl.program_id(1) == 0)
    def _project_kv():
        x_kv = xkv_ref[0]                         # (S, D) bf16 (pre-cast on host)
        k = jnp.dot(x_kv, wk_ref[...], preferred_element_type=jnp.float32) + bk_ref[...]
        v = jnp.dot(x_kv, wv_ref[...], preferred_element_type=jnp.float32) + bv_ref[...]
        k_scr[...] = k.astype(jnp.bfloat16)
        v_scr[...] = v.astype(jnp.bfloat16)

    # --- Q projection: one full-width matmul; scale already folded into Wq/bq ---
    xq_bf = x_q.astype(jnp.bfloat16)
    q = jnp.dot(xq_bf, wq_ref[...], preferred_element_type=jnp.float32) + bq_ref[...]
    # Per-head lane views (static slices of the projection output; cheap).
    q_heads = [q[:, h * hd:(h + 1) * hd].astype(jnp.bfloat16) for h in range(H)]

    # --- flash-style streaming attention over KV blocks (online softmax, f32) ---
    def kv_step(i, carry):
        off = pl.multiple_of(i * TK, TK)
        kb = k_scr[pl.ds(off, TK), :]             # (TK, D) bf16
        vb = v_scr[pl.ds(off, TK), :]
        new_carry = []
        for h in range(H):                        # small static head loop, all 2-D ops
            m_h, l_h, a_h = carry[h]
            k_h = kb[:, h * hd:(h + 1) * hd]
            v_h = vb[:, h * hd:(h + 1) * hd]
            s = jax.lax.dot_general(q_heads[h], k_h, (((1,), (1,)), ((), ())),
                                    preferred_element_type=jnp.float32)       # (TQ, TK)
            m_new = jnp.maximum(m_h, jnp.max(s, axis=-1, keepdims=True))
            alpha = jnp.exp(m_h - m_new)
            p = jnp.exp(s - m_new)
            l_new = alpha * l_h + jnp.sum(p, axis=-1, keepdims=True)
            a_new = alpha * a_h + jnp.dot(p.astype(jnp.bfloat16), v_h,
                                          preferred_element_type=jnp.float32)
            new_carry.append((m_new, l_new, a_new))
        return tuple(new_carry)

    init = tuple((jnp.full((TQ, 1), -jnp.inf, jnp.float32),
                  jnp.zeros((TQ, 1), jnp.float32),
                  jnp.zeros((TQ, hd), jnp.float32)) for _ in range(H))
    final = jax.lax.fori_loop(0, n_kv, kv_step, init)

    # TODO(synk): attention-prob dropout omitted (identity in eval mode).
    ctx = jnp.concatenate(
        [a * pl.reciprocal(l, approx=True) for (_, l, a) in final], axis=-1)   # (TQ, D)

    # --- fc_out: single matmul on the lane-concatenated heads ---
    attn_out = jnp.dot(ctx.astype(jnp.bfloat16), wo_ref[...],
                       preferred_element_type=jnp.float32) + bo_ref[...]

    # --- residual + LayerNorm (f32 math) ---
    res = x_q + attn_out
    mean = jnp.mean(res, axis=-1, keepdims=True)
    var = jnp.mean((res - mean) ** 2, axis=-1, keepdims=True)
    y = (res - mean) * jax.lax.rsqrt(var + ln_eps)
    y = y * gamma_ref[...] + beta_ref[...]

    # --- feed-forward: Linear(D, 2D) -> ReLU -> Linear(2D, D) ---
    h1 = jnp.dot(y.astype(jnp.bfloat16), w1_ref[...],
                 preferred_element_type=jnp.float32) + b1_ref[...]
    h1 = jnp.maximum(h1, 0.0)
    out = jnp.dot(h1.astype(jnp.bfloat16), w2_ref[...],
                  preferred_element_type=jnp.float32) + b2_ref[...]
    o_ref[0] = out


def _is_v7_device():
    try:
        kind = jax.devices()[0].device_kind.lower()
    except Exception:
        return False
    return ("v7" in kind) or ("tpu7" in kind)


def _pick_vmem_limit_bytes():
    # v7x has only 64 MiB/TC -> leave headroom; v5e/v6e have 128 MiB -> use most.
    return (48 if _is_v7_device() else 96) * 1024 * 1024


def multi_head_attention(x, params, *, num_heads, q_block=256, kv_block=512,
                         ln_eps=1e-5, vmem_limit_bytes=None,
                         single_buffer_weights=None):
    """x: (B, S, D) float32 (used as query, key and value). params: see init_params."""
    B, S, D = x.shape
    assert D % num_heads == 0
    hd = D // num_heads
    d_ff = params["w1"].shape[1]

    TQ = min(q_block, S)
    TK = min(kv_block, S)
    assert S % TQ == 0 and (TQ % 8 == 0 or TQ == S)
    assert S % TK == 0 and (TK % 8 == 0 or TK == S)
    NQ = S // TQ

    if vmem_limit_bytes is None:
        vmem_limit_bytes = _pick_vmem_limit_bytes()
    if single_buffer_weights is None:
        single_buffer_weights = _is_v7_device()     # VMEM-starved generation only

    scale = 1.0 / math.sqrt(hd)
    bf16 = jnp.bfloat16
    # All matmul weights stored bf16 (f32 MXU accumulation); biases / LN stay f32.
    # 1/sqrt(hd) folded into the Q projection.
    wq = (params["wq"] * scale).astype(bf16)
    bq = (params["bq"] * scale).astype(jnp.float32)
    wk = params["wk"].astype(bf16)
    wv = params["wv"].astype(bf16)
    wo = params["wo"].astype(bf16)
    w1 = params["w1"].astype(bf16)
    w2 = params["w2"].astype(bf16)

    kernel = functools.partial(_mha_block_kernel, num_heads=num_heads,
                               head_dim=hd, kv_block=TK, ln_eps=ln_eps)

    def const_spec(shape):
        zeros = (0,) * len(shape)

        def index_map(b, q):
            return zeros

        if single_buffer_weights:
            try:
                # Grid-invariant weights: single-buffer to halve their VMEM use.
                return pl.BlockSpec(shape, index_map, pipeline_mode=pl.Buffered(1))
            except (TypeError, AttributeError):
                pass
        return pl.BlockSpec(shape, index_map)

    in_specs = [
        pl.BlockSpec((1, TQ, D), lambda b, q: (b, q, 0)),   # x (f32): query/residual rows
        pl.BlockSpec((1, S, D), lambda b, q: (b, 0, 0)),    # x (bf16): key/value rows
        const_spec((D, D)), const_spec((1, D)),             # Wq (scaled), bq (scaled)
        const_spec((D, D)), const_spec((1, D)),             # Wk, bk
        const_spec((D, D)), const_spec((1, D)),             # Wv, bv
        const_spec((D, D)), const_spec((1, D)),             # Wo, bo
        const_spec((1, D)), const_spec((1, D)),             # LayerNorm gamma, beta
        const_spec((D, d_ff)), const_spec((1, d_ff)),       # FFN layer 1
        const_spec((d_ff, D)), const_spec((1, D)),          # FFN layer 2
    ]

    return pl.pallas_call(
        kernel,
        out_shape=jax.ShapeDtypeStruct((B, S, D), jnp.float32),
        grid=(B, NQ),
        in_specs=in_specs,
        out_specs=pl.BlockSpec((1, TQ, D), lambda b, q: (b, q, 0)),
        scratch_shapes=[pltpu.VMEM((S, D), bf16),            # K scratch (per batch)
                        pltpu.VMEM((S, D), bf16)],            # V scratch (per batch)
        compiler_params=pltpu.CompilerParams(
            # q axis must be 'arbitrary' (in-order) so the per-batch K/V scratch
            # written at q == 0 is valid for the later query tiles of that batch.
            # TODO(synk): for v7x with tiny B, precompute K/V in a separate
            # pallas_call so the q axis can stay 'parallel' across both cores.
            dimension_semantics=("parallel", "arbitrary"),
            vmem_limit_bytes=vmem_limit_bytes),
    )(x, x.astype(bf16),
      wq, bq, wk, params["bk"], wv, params["bv"], wo, params["bo"],
      params["gamma"], params["beta"],
      w1, params["b1"], w2, params["b2"])


def init_params(key, d_model):
    ks = jax.random.split(key, 12)
    s = 0.02
    d_ff = 2 * d_model
    return {
        "wq": s * jax.random.normal(ks[0], (d_model, d_model), jnp.float32),
        "bq": s * jax.random.normal(ks[1], (1, d_model), jnp.float32),
        "wk": s * jax.random.normal(ks[2], (d_model, d_model), jnp.float32),
        "bk": s * jax.random.normal(ks[3], (1, d_model), jnp.float32),
        "wv": s * jax.random.normal(ks[4], (d_model, d_model), jnp.float32),
        "bv": s * jax.random.normal(ks[5], (1, d_model), jnp.float32),
        "wo": s * jax.random.normal(ks[6], (d_model, d_model), jnp.float32),
        "bo": s * jax.random.normal(ks[7], (1, d_model), jnp.float32),
        "gamma": jnp.ones((1, d_model), jnp.float32),
        "beta": jnp.zeros((1, d_model), jnp.float32),
        "w1": s * jax.random.normal(ks[8], (d_model, d_ff), jnp.float32),
        "b1": s * jax.random.normal(ks[9], (1, d_ff), jnp.float32),
        "w2": s * jax.random.normal(ks[10], (d_ff, d_model), jnp.float32),
        "b2": s * jax.random.normal(ks[11], (1, d_model), jnp.float32),
    }


def _reference(x, params, *, num_heads, ln_eps=1e-5):
    """Pure-JAX f32 reference mirroring the PyTorch forward (eval mode)."""
    B, S, D = x.shape
    hd = D // num_heads

    def lin(z, w, b):
        return jnp.einsum("bsd,de->bse", z, w) + b[0]

    def heads(z):
        return z.reshape(B, S, num_heads, hd).transpose(0, 2, 1, 3)

    q = heads(lin(x, params["wq"], params["bq"]))
    k = heads(lin(x, params["wk"], params["bk"]))
    v = heads(lin(x, params["wv"], params["bv"]))
    scores = jnp.einsum("bhqd,bhkd->bhqk", q, k) / math.sqrt(hd)
    p = jax.nn.softmax(scores, axis=-1)
    ctx = jnp.einsum("bhqk,bhkd->bhqd", p, v).transpose(0, 2, 1, 3).reshape(B, S, D)
    out = lin(ctx, params["wo"], params["bo"])
    res = x + out          # residual w.r.t. the layer input (see header note)
    mean = res.mean(-1, keepdims=True)
    var = ((res - mean) ** 2).mean(-1, keepdims=True)
    y = (res - mean) / jnp.sqrt(var + ln_eps) * params["gamma"][0] + params["beta"][0]
    h = jnp.maximum(lin(y, params["w1"], params["b1"]), 0.0)
    return lin(h, params["w2"], params["b2"])


if __name__ == "__main__":
    def run_case(batch, seq_len, d_model, n_heads, q_block, kv_block, tol):
        key = jax.random.PRNGKey(0)
        k_x, k_p = jax.random.split(key)
        x = jax.random.normal(k_x, (batch, seq_len, d_model), jnp.float32)
        params = init_params(k_p, d_model)
        out = multi_head_attention(x, params, num_heads=n_heads,
                                   q_block=q_block, kv_block=kv_block)
        out = jax.block_until_ready(out)
        ref = _reference(x, params, num_heads=n_heads)
        assert out.shape == (batch, seq_len, d_model)
        max_err = float(jnp.max(jnp.abs(out - ref)))
        # bf16 MXU inputs + approx softmax reciprocal vs pure-f32 reference.
        assert jnp.allclose(out, ref, atol=tol, rtol=tol), (
            f"mismatch vs reference at ({batch},{seq_len},{d_model},{n_heads}): "
            f"max abs err {max_err}")

    # Small shapes consistent with the module (single tile, single KV block).
    run_case(2, 8, 32, 4, q_block=8, kv_block=8, tol=1e-2)
    # Tiled case: exercises query tiling (NQ=4), KV streaming (n_kv=4),
    # the per-batch K/V scratch hoist and the (8,128) layout paths.
    run_case(2, 512, 256, 8, q_block=128, kv_block=128, tol=2e-2)

    print("KERNEL_OK")
</pallas_src>

<mosaic_0001>
module attributes {stable_mosaic.version = 11 : i64} {
  func.func @_mha_block_kernel(%arg0: i32, %arg1: i32, %arg2: memref<1x8x32xf32, #tpu.memory_space<vmem>>, %arg3: memref<1x8x32xbf16, #tpu.memory_space<vmem>>, %arg4: memref<32x32xbf16, #tpu.memory_space<vmem>>, %arg5: memref<1x32xf32, #tpu.memory_space<vmem>>, %arg6: memref<32x32xbf16, #tpu.memory_space<vmem>>, %arg7: memref<1x32xf32, #tpu.memory_space<vmem>>, %arg8: memref<32x32xbf16, #tpu.memory_space<vmem>>, %arg9: memref<1x32xf32, #tpu.memory_space<vmem>>, %arg10: memref<32x32xbf16, #tpu.memory_space<vmem>>, %arg11: memref<1x32xf32, #tpu.memory_space<vmem>>, %arg12: memref<1x32xf32, #tpu.memory_space<vmem>>, %arg13: memref<1x32xf32, #tpu.memory_space<vmem>>, %arg14: memref<32x64xbf16, #tpu.memory_space<vmem>>, %arg15: memref<1x64xf32, #tpu.memory_space<vmem>>, %arg16: memref<64x32xbf16, #tpu.memory_space<vmem>>, %arg17: memref<1x32xf32, #tpu.memory_space<vmem>>, %arg18: memref<1x8x32xf32, #tpu.memory_space<vmem>>, %arg19: memref<8x32xbf16, #tpu.memory_space<vmem>>, %arg20: memref<8x32xbf16, #tpu.memory_space<vmem>>) attributes {dimension_semantics = [#tpu.dimension_semantics<parallel>, #tpu.dimension_semantics<arbitrary>], iteration_bounds = array<i64: 2, 1>, scalar_prefetch = 0 : i64, scratch_operands = 2 : i64, tpu.core_type = #tpu.core_type<tc>, window_params = [{transform_indices = @transform_0, window_bounds = array<i64: 1, 8, 32>}, {transform_indices = @transform_1, window_bounds = array<i64: 1, 8, 32>}, {pipeline_mode = #tpu.pipeline_mode<synchronous>, transform_indices = @transform_2, window_bounds = array<i64: 32, 32>}, {pipeline_mode = #tpu.pipeline_mode<synchronous>, transform_indices = @transform_3, window_bounds = array<i64: 1, 32>}, {pipeline_mode = #tpu.pipeline_mode<synchronous>, transform_indices = @transform_4, window_bounds = array<i64: 32, 32>}, {pipeline_mode = #tpu.pipeline_mode<synchronous>, transform_indices = @transform_5, window_bounds = array<i64: 1, 32>}, {pipeline_mode = #tpu.pipeline_mode<synchronous>, transform_indices = @transform_6, window_bounds = array<i64: 32, 32>}, {pipeline_mode = #tpu.pipeline_mode<synchronous>, transform_indices = @transform_7, window_bounds = array<i64: 1, 32>}, {pipeline_mode = #tpu.pipeline_mode<synchronous>, transform_indices = @transform_8, window_bounds = array<i64: 32, 32>}, {pipeline_mode = #tpu.pipeline_mode<synchronous>, transform_indices = @transform_9, window_bounds = array<i64: 1, 32>}, {pipeline_mode = #tpu.pipeline_mode<synchronous>, transform_indices = @transform_10, window_bounds = array<i64: 1, 32>}, {pipeline_mode = #tpu.pipeline_mode<synchronous>, transform_indices = @transform_11, window_bounds = array<i64: 1, 32>}, {pipeline_mode = #tpu.pipeline_mode<synchronous>, transform_indices = @transform_12, window_bounds = array<i64: 32, 64>}, {pipeline_mode = #tpu.pipeline_mode<synchronous>, transform_indices = @transform_13, window_bounds = array<i64: 1, 64>}, {pipeline_mode = #tpu.pipeline_mode<synchronous>, transform_indices = @transform_14, window_bounds = array<i64: 64, 32>}, {pipeline_mode = #tpu.pipeline_mode<synchronous>, transform_indices = @transform_15, window_bounds = array<i64: 1, 32>}, {transform_indices = @transform_16, window_bounds = array<i64: 1, 8, 32>}]} {
    %c0 = arith.constant 0 : index
    %c0_0 = arith.constant 0 : index
    %c0_1 = arith.constant 0 : index
    %0 = vector.load %arg2[%c0, %c0_0, %c0_1] : memref<1x8x32xf32, #tpu.memory_space<vmem>>, vector<1x8x32xf32>
    %1 = vector.shape_cast %0 : vector<1x8x32xf32> to vector<8x32xf32>
    %c0_i32 = arith.constant 0 : i32
    %2 = arith.cmpi eq, %arg1, %c0_i32 : i32
    %3 = arith.extui %2 : i1 to i32
    %c0_i32_2 = arith.constant 0 : i32
    %4 = arith.cmpi ne, %3, %c0_i32_2 : i32
    scf.if %4 {
      %c0_66 = arith.constant 0 : index
      %c0_67 = arith.constant 0 : index
      %c0_68 = arith.constant 0 : index
      %178 = vector.load %arg3[%c0_66, %c0_67, %c0_68] : memref<1x8x32xbf16, #tpu.memory_space<vmem>>, vector<1x8x32xbf16>
      %179 = vector.shape_cast %178 : vector<1x8x32xbf16> to vector<8x32xbf16>
      %c0_69 = arith.constant 0 : index
      %c0_70 = arith.constant 0 : index
      %180 = vector.load %arg6[%c0_69, %c0_70] : memref<32x32xbf16, #tpu.memory_space<vmem>>, vector<32x32xbf16>
      %cst_71 = arith.constant dense<0.000000e+00> : vector<8x32xf32>
      %181 = tpu.matmul %179, %180, %cst_71 {dimension_numbers = #tpu.dot_dimension_numbers<[1], [0], [0], [1], [0, 0, 1, 1], [], []>} : vector<8x32xbf16>, vector<32x32xbf16>, vector<8x32xf32> -> vector<8x32xf32>
      %c0_72 = arith.constant 0 : index
      %c0_73 = arith.constant 0 : index
      %182 = vector.load %arg7[%c0_72, %c0_73] : memref<1x32xf32, #tpu.memory_space<vmem>>, vector<1x32xf32>
      %183 = vector.broadcast %182 : vector<1x32xf32> to vector<8x32xf32>
      %184 = arith.addf %181, %183 : vector<8x32xf32>
      %c0_74 = arith.constant 0 : index
      %c0_75 = arith.constant 0 : index
      %185 = vector.load %arg8[%c0_74, %c0_75] : memref<32x32xbf16, #tpu.memory_space<vmem>>, vector<32x32xbf16>
      %cst_76 = arith.constant dense<0.000000e+00> : vector<8x32xf32>
      %186 = tpu.matmul %179, %185, %cst_76 {dimension_numbers = #tpu.dot_dimension_numbers<[1], [0], [0], [1], [0, 0, 1, 1], [], []>} : vector<8x32xbf16>, vector<32x32xbf16>, vector<8x32xf32> -> vector<8x32xf32>
      %c0_77 = arith.constant 0 : index
      %c0_78 = arith.constant 0 : index
      %187 = vector.load %arg9[%c0_77, %c0_78] : memref<1x32xf32, #tpu.memory_space<vmem>>, vector<1x32xf32>
      %188 = vector.broadcast %187 : vector<1x32xf32> to vector<8x32xf32>
      %189 = arith.addf %186, %188 : vector<8x32xf32>
      %190 = arith.truncf %184 : vector<8x32xf32> to vector<8x32xbf16>
      %c0_79 = arith.constant 0 : index
      %c0_80 = arith.constant 0 : index
      %191 = vector.load %arg19[%c0_79, %c0_80] : memref<8x32xbf16, #tpu.memory_space<vmem>>, vector<8x32xbf16>
      tpu.vector_store %arg19[%c0_79, %c0_80], %190 {strides = array<i32>} : memref<8x32xbf16, #tpu.memory_space<vmem>>, vector<8x32xbf16>,
      %192 = arith.truncf %189 : vector<8x32xf32> to vector<8x32xbf16>
      %c0_81 = arith.constant 0 : index
      %c0_82 = arith.constant 0 : index
      %193 = vector.load %arg20[%c0_81, %c0_82] : memref<8x32xbf16, #tpu.memory_space<vmem>>, vector<8x32xbf16>
      tpu.vector_store %arg20[%c0_81, %c0_82], %192 {strides = array<i32>} : memref<8x32xbf16, #tpu.memory_space<vmem>>, vector<8x32xbf16>,
    } else {
    }
    %5 = arith.truncf %1 : vector<8x32xf32> to vector<8x32xbf16>
    %c0_3 = arith.constant 0 : index
    %c0_4 = arith.constant 0 : index
    %6 = vector.load %arg4[%c0_3, %c0_4] : memref<32x32xbf16, #tpu.memory_space<vmem>>, vector<32x32xbf16>
    %cst = arith.constant dense<0.000000e+00> : vector<8x32xf32>
    %7 = tpu.matmul %5, %6, %cst {dimension_numbers = #tpu.dot_dimension_numbers<[1], [0], [0], [1], [0, 0, 1, 1], [], []>} : vector<8x32xbf16>, vector<32x32xbf16>, vector<8x32xf32> -> vector<8x32xf32>
    %c0_5 = arith.constant 0 : index
    %c0_6 = arith.constant 0 : index
    %8 = vector.load %arg5[%c0_5, %c0_6] : memref<1x32xf32, #tpu.memory_space<vmem>>, vector<1x32xf32>
    %9 = vector.broadcast %8 : vector<1x32xf32> to vector<8x32xf32>
    %10 = arith.addf %7, %9 : vector<8x32xf32>
    %11 = vector.extract_strided_slice %10 {offsets = [0, 0], sizes = [8, 8], strides = [1, 1]} : vector<8x32xf32> to vector<8x8xf32>
    %12 = arith.truncf %11 : vector<8x8xf32> to vector<8x8xbf16>
    %13 = vector.extract_strided_slice %10 {offsets = [0, 8], sizes = [8, 8], strides = [1, 1]} : vector<8x32xf32> to vector<8x8xf32>
    %14 = arith.truncf %13 : vector<8x8xf32> to vector<8x8xbf16>
    %15 = vector.extract_strided_slice %10 {offsets = [0, 16], sizes = [8, 8], strides = [1, 1]} : vector<8x32xf32> to vector<8x8xf32>
    %16 = arith.truncf %15 : vector<8x8xf32> to vector<8x8xbf16>
    %17 = vector.extract_strided_slice %10 {offsets = [0, 24], sizes = [8, 8], strides = [1, 1]} : vector<8x32xf32> to vector<8x8xf32>
    %18 = arith.truncf %17 : vector<8x8xf32> to vector<8x8xbf16>
    %cst_7 = arith.constant 0xFF800000 : f32
    %19 = vector.broadcast %cst_7 : f32 to vector<8x1xf32>
    %cst_8 = arith.constant 0.000000e+00 : f32
    %20 = vector.broadcast %cst_8 : f32 to vector<8x1xf32>
    %cst_9 = arith.constant 0.000000e+00 : f32
    %21 = vector.broadcast %cst_9 : f32 to vector<8x8xf32>
    %cst_10 = arith.constant 0xFF800000 : f32
    %22 = vector.broadcast %cst_10 : f32 to vector<8x1xf32>
    %cst_11 = arith.constant 0.000000e+00 : f32
    %23 = vector.broadcast %cst_11 : f32 to vector<8x1xf32>
    %cst_12 = arith.constant 0.000000e+00 : f32
    %24 = vector.broadcast %cst_12 : f32 to vector<8x8xf32>
    %cst_13 = arith.constant 0xFF800000 : f32
    %25 = vector.broadcast %cst_13 : f32 to vector<8x1xf32>
    %cst_14 = arith.constant 0.000000e+00 : f32
    %26 = vector.broadcast %cst_14 : f32 to vector<8x1xf32>
    %cst_15 = arith.constant 0.000000e+00 : f32
    %27 = vector.broadcast %cst_15 : f32 to vector<8x8xf32>
    %cst_16 = arith.constant 0xFF800000 : f32
    %28 = vector.broadcast %cst_16 : f32 to vector<8x1xf32>
    %cst_17 = arith.constant 0.000000e+00 : f32
    %29 = vector.broadcast %cst_17 : f32 to vector<8x1xf32>
    %cst_18 = arith.constant 0.000000e+00 : f32
    %30 = vector.broadcast %cst_18 : f32 to vector<8x8xf32>
    %c0_i32_19 = arith.constant 0 : i32
    %c8_i32 = arith.constant 8 : i32
    %31 = arith.muli %c0_i32_19, %c8_i32 : i32
    %32 = tpu.assume_multiple %31, 8 : i32
    %33 = arith.index_cast %32 : i32 to index
    %c0_20 = arith.constant 0 : index
    %34 = vector.load %arg19[%33, %c0_20] : memref<8x32xbf16, #tpu.memory_space<vmem>>, vector<8x32xbf16>
    %35 = arith.index_cast %32 : i32 to index
    %c0_21 = arith.constant 0 : index
    %36 = vector.load %arg20[%35, %c0_21] : memref<8x32xbf16, #tpu.memory_space<vmem>>, vector<8x32xbf16>
    %37 = vector.extract_strided_slice %34 {offsets = [0, 0], sizes = [8, 8], strides = [1, 1]} : vector<8x32xbf16> to vector<8x8xbf16>
    %38 = vector.extract_strided_slice %36 {offsets = [0, 0], sizes = [8, 8], strides = [1, 1]} : vector<8x32xbf16> to vector<8x8xbf16>
    %cst_22 = arith.constant dense<0.000000e+00> : vector<8x8xf32>
    %39 = tpu.matmul %12, %37, %cst_22 {dimension_numbers = #tpu.dot_dimension_numbers<[1], [1], [0], [0], [0, 0, 1, 0], [], []>} : vector<8x8xbf16>, vector<8x8xbf16>, vector<8x8xf32> -> vector<8x8xf32>
    %cst_23 = arith.constant dense<0xFF800000> : vector<8xf32>
    %40 = vector.multi_reduction <maximumf>, %39, %cst_23 [1] : vector<8x8xf32> to vector<8xf32>
    %41 = vector.shape_cast %40 : vector<8xf32> to vector<8x1xf32>
    %42 = arith.maximumf %19, %41 : vector<8x1xf32>
    %43 = arith.subf %19, %42 : vector<8x1xf32>
    %44 = math.exp %43 : vector<8x1xf32>
    %45 = vector.broadcast %42 : vector<8x1xf32> to vector<8x8xf32>
    %46 = arith.subf %39, %45 : vector<8x8xf32>
    %47 = math.exp %46 : vector<8x8xf32>
    %48 = arith.mulf %44, %20 : vector<8x1xf32>
    %cst_24 = arith.constant dense<0.000000e+00> : vector<8xf32>
    %49 = vector.multi_reduction <add>, %47, %cst_24 [1] : vector<8x8xf32> to vector<8xf32>
    %50 = vector.shape_cast %49 : vector<8xf32> to vector<8x1xf32>
    %51 = arith.addf %48, %50 : vector<8x1xf32>
    %52 = vector.broadcast %44 : vector<8x1xf32> to vector<8x8xf32>
    %53 = arith.mulf %52, %21 : vector<8x8xf32>
    %54 = arith.truncf %47 : vector<8x8xf32> to vector<8x8xbf16>
    %cst_25 = arith.constant dense<0.000000e+00> : vector<8x8xf32>
    %55 = tpu.matmul %54, %38, %cst_25 {dimension_numbers = #tpu.dot_dimension_numbers<[1], [0], [0], [1], [0, 0, 1, 1], [], []>} : vector<8x8xbf16>, vector<8x8xbf16>, vector<8x8xf32> -> vector<8x8xf32>
    %56 = arith.addf %53, %55 : vector<8x8xf32>
    %57 = vector.extract_strided_slice %34 {offsets = [0, 8], sizes = [8, 8], strides = [1, 1]} : vector<8x32xbf16> to vector<8x8xbf16>
    %58 = vector.extract_strided_slice %36 {offsets = [0, 8], sizes = [8, 8], strides = [1, 1]} : vector<8x32xbf16> to vector<8x8xbf16>
    %cst_26 = arith.constant dense<0.000000e+00> : vector<8x8xf32>
    %59 = tpu.matmul %14, %57, %cst_26 {dimension_numbers = #tpu.dot_dimension_numbers<[1], [1], [0], [0], [0, 0, 1, 0], [], []>} : vector<8x8xbf16>, vector<8x8xbf16>, vector<8x8xf32> -> vector<8x8xf32>
    %cst_27 = arith.constant dense<0xFF800000> : vector<8xf32>
    %60 = vector.multi_reduction <maximumf>, %59, %cst_27 [1] : vector<8x8xf32> to vector<8xf32>
    %61 = vector.shape_cast %60 : vector<8xf32> to vector<8x1xf32>
    %62 = arith.maximumf %22, %61 : vector<8x1xf32>
    %63 = arith.subf %22, %62 : vector<8x1xf32>
    %64 = math.exp %63 : vector<8x1xf32>
    %65 = vector.broadcast %62 : vector<8x1xf32> to vector<8x8xf32>
    %66 = arith.subf %59, %65 : vector<8x8xf32>
    %67 = math.exp %66 : vector<8x8xf32>
    %68 = arith.mulf %64, %23 : vector<8x1xf32>
    %cst_28 = arith.constant dense<0.000000e+00> : vector<8xf32>
    %69 = vector.multi_reduction <add>, %67, %cst_28 [1] : vector<8x8xf32> to vector<8xf32>
    %70 = vector.shape_cast %69 : vector<8xf32> to vector<8x1xf32>
    %71 = arith.addf %68, %70 : vector<8x1xf32>
    %72 = vector.broadcast %64 : vector<8x1xf32> to vector<8x8xf32>
    %73 = arith.mulf %72, %24 : vector<8x8xf32>
    %74 = arith.truncf %67 : vector<8x8xf32> to vector<8x8xbf16>
    %cst_29 = arith.constant dense<0.000000e+00> : vector<8x8xf32>
    %75 = tpu.matmul %74, %58, %cst_29 {dimension_numbers = #tpu.dot_dimension_numbers<[1], [0], [0], [1], [0, 0, 1, 1], [], []>} : vector<8x8xbf16>, vector<8x8xbf16>, vector<8x8xf32> -> vector<8x8xf32>
    %76 = arith.addf %73, %75 : vector<8x8xf32>
    %77 = vector.extract_strided_slice %34 {offsets = [0, 16], sizes = [8, 8], strides = [1, 1]} : vector<8x32xbf16> to vector<8x8xbf16>
    %78 = vector.extract_strided_slice %36 {offsets = [0, 16], sizes = [8, 8], strides = [1, 1]} : vector<8x32xbf16> to vector<8x8xbf16>
    %cst_30 = arith.constant dense<0.000000e+00> : vector<8x8xf32>
    %79 = tpu.matmul %16, %77, %cst_30 {dimension_numbers = #tpu.dot_dimension_numbers<[1], [1], [0], [0], [0, 0, 1, 0], [], []>} : vector<8x8xbf16>, vector<8x8xbf16>, vector<8x8xf32> -> vector<8x8xf32>
    %cst_31 = arith.constant dense<0xFF800000> : vector<8xf32>
    %80 = vector.multi_reduction <maximumf>, %79, %cst_31 [1] : vector<8x8xf32> to vector<8xf32>
    %81 = vector.shape_cast %80 : vector<8xf32> to vector<8x1xf32>
    %82 = arith.maximumf %25, %81 : vector<8x1xf32>
    %83 = arith.subf %25, %82 : vector<8x1xf32>
    %84 = math.exp %83 : vector<8x1xf32>
    %85 = vector.broadcast %82 : vector<8x1xf32> to vector<8x8xf32>
    %86 = arith.subf %79, %85 : vector<8x8xf32>
    %87 = math.exp %86 : vector<8x8xf32>
    %88 = arith.mulf %84, %26 : vector<8x1xf32>
    %cst_32 = arith.constant dense<0.000000e+00> : vector<8xf32>
    %89 = vector.multi_reduction <add>, %87, %cst_32 [1] : vector<8x8xf32> to vector<8xf32>
    %90 = vector.shape_cast %89 : vector<8xf32> to vector<8x1xf32>
    %91 = arith.addf %88, %90 : vector<8x1xf32>
    %92 = vector.broadcast %84 : vector<8x1xf32> to vector<8x8xf32>
    %93 = arith.mulf %92, %27 : vector<8x8xf32>
    %94 = arith.truncf %87 : vector<8x8xf32> to vector<8x8xbf16>
    %cst_33 = arith.constant dense<0.000000e+00> : vector<8x8xf32>
    %95 = tpu.matmul %94, %78, %cst_33 {dimension_numbers = #tpu.dot_dimension_numbers<[1], [0], [0], [1], [0, 0, 1, 1], [], []>} : vector<8x8xbf16>, vector<8x8xbf16>, vector<8x8xf32> -> vector<8x8xf32>
    %96 = arith.addf %93, %95 : vector<8x8xf32>
    %97 = vector.extract_strided_slice %34 {offsets = [0, 24], sizes = [8, 8], strides = [1, 1]} : vector<8x32xbf16> to vector<8x8xbf16>
    %98 = vector.extract_strided_slice %36 {offsets = [0, 24], sizes = [8, 8], strides = [1, 1]} : vector<8x32xbf16> to vector<8x8xbf16>
    %cst_34 = arith.constant dense<0.000000e+00> : vector<8x8xf32>
    %99 = tpu.matmul %18, %97, %cst_34 {dimension_numbers = #tpu.dot_dimension_numbers<[1], [1], [0], [0], [0, 0, 1, 0], [], []>} : vector<8x8xbf16>, vector<8x8xbf16>, vector<8x8xf32> -> vector<8x8xf32>
    %cst_35 = arith.constant dense<0xFF800000> : vector<8xf32>
    %100 = vector.multi_reduction <maximumf>, %99, %cst_35 [1] : vector<8x8xf32> to vector<8xf32>
    %101 = vector.shape_cast %100 : vector<8xf32> to vector<8x1xf32>
    %102 = arith.maximumf %28, %101 : vector<8x1xf32>
    %103 = arith.subf %28, %102 : vector<8x1xf32>
    %104 = math.exp %103 : vector<8x1xf32>
    %105 = vector.broadcast %102 : vector<8x1xf32> to vector<8x8xf32>
    %106 = arith.subf %99, %105 : vector<8x8xf32>
    %107 = math.exp %106 : vector<8x8xf32>
    %108 = arith.mulf %104, %29 : vector<8x1xf32>
    %cst_36 = arith.constant dense<0.000000e+00> : vector<8xf32>
    %109 = vector.multi_reduction <add>, %107, %cst_36 [1] : vector<8x8xf32> to vector<8xf32>
    %110 = vector.shape_cast %109 : vector<8xf32> to vector<8x1xf32>
    %111 = arith.addf %108, %110 : vector<8x1xf32>
    %112 = vector.broadcast %104 : vector<8x1xf32> to vector<8x8xf32>
    %113 = arith.mulf %112, %30 : vector<8x8xf32>
    %114 = arith.truncf %107 : vector<8x8xf32> to vector<8x8xbf16>
    %cst_37 = arith.constant dense<0.000000e+00> : vector<8x8xf32>
    %115 = tpu.matmul %114, %98, %cst_37 {dimension_numbers = #tpu.dot_dimension_numbers<[1], [0], [0], [1], [0, 0, 1, 1], [], []>} : vector<8x8xbf16>, vector<8x8xbf16>, vector<8x8xf32> -> vector<8x8xf32>
    %116 = arith.addf %113, %115 : vector<8x8xf32>
    %c1_i32 = arith.constant 1 : i32
    %117 = tpu.reciprocal %51 {approx = true} : vector<8x1xf32> -> vector<8x1xf32>
    %118 = vector.broadcast %117 : vector<8x1xf32> to vector<8x8xf32>
    %119 = arith.mulf %56, %118 : vector<8x8xf32>
    %120 = tpu.reciprocal %71 {approx = true} : vector<8x1xf32> -> vector<8x1xf32>
    %121 = vector.broadcast %120 : vector<8x1xf32> to vector<8x8xf32>
    %122 = arith.mulf %76, %121 : vector<8x8xf32>
    %123 = tpu.reciprocal %91 {approx = true} : vector<8x1xf32> -> vector<8x1xf32>
    %124 = vector.broadcast %123 : vector<8x1xf32> to vector<8x8xf32>
    %125 = arith.mulf %96, %124 : vector<8x8xf32>
    %126 = tpu.reciprocal %111 {approx = true} : vector<8x1xf32> -> vector<8x1xf32>
    %127 = vector.broadcast %126 : vector<8x1xf32> to vector<8x8xf32>
    %128 = arith.mulf %116, %127 : vector<8x8xf32>
    %129 = tpu.concatenate %119, %122, %125, %128 in 1 : vector<8x8xf32>, vector<8x8xf32>, vector<8x8xf32>, vector<8x8xf32> -> vector<8x32xf32>
    %130 = arith.truncf %129 : vector<8x32xf32> to vector<8x32xbf16>
    %c0_38 = arith.constant 0 : index
    %c0_39 = arith.constant 0 : index
    %131 = vector.load %arg10[%c0_38, %c0_39] : memref<32x32xbf16, #tpu.memory_space<vmem>>, vector<32x32xbf16>
    %cst_40 = arith.constant dense<0.000000e+00> : vector<8x32xf32>
    %132 = tpu.matmul %130, %131, %cst_40 {dimension_numbers = #tpu.dot_dimension_numbers<[1], [0], [0], [1], [0, 0, 1, 1], [], []>} : vector<8x32xbf16>, vector<32x32xbf16>, vector<8x32xf32> -> vector<8x32xf32>
    %c0_41 = arith.constant 0 : index
    %c0_42 = arith.constant 0 : index
    %133 = vector.load %arg11[%c0_41, %c0_42] : memref<1x32xf32, #tpu.memory_space<vmem>>, vector<1x32xf32>
    %134 = vector.broadcast %133 : vector<1x32xf32> to vector<8x32xf32>
    %135 = arith.addf %132, %134 : vector<8x32xf32>
    %136 = arith.addf %1, %135 : vector<8x32xf32>
    %cst_43 = arith.constant dense<0.000000e+00> : vector<8xf32>
    %137 = vector.multi_reduction <add>, %136, %cst_43 [1] : vector<8x32xf32> to vector<8xf32>
    %138 = vector.shape_cast %137 : vector<8xf32> to vector<8x1xf32>
    %cst_44 = arith.constant 3.200000e+01 : f32
    %139 = vector.broadcast %cst_44 : f32 to vector<8x1xf32>
    %140 = arith.divf %138, %139 : vector<8x1xf32>
    %141 = vector.broadcast %140 : vector<8x1xf32> to vector<8x32xf32>
    %142 = arith.subf %136, %141 : vector<8x32xf32>
    %143 = arith.mulf %142, %142 : vector<8x32xf32>
    %cst_45 = arith.constant dense<0.000000e+00> : vector<8xf32>
    %144 = vector.multi_reduction <add>, %143, %cst_45 [1] : vector<8x32xf32> to vector<8xf32>
    %145 = vector.shape_cast %144 : vector<8xf32> to vector<8x1xf32>
    %cst_46 = arith.constant 3.200000e+01 : f32
    %146 = vector.broadcast %cst_46 : f32 to vector<8x1xf32>
    %147 = arith.divf %145, %146 : vector<8x1xf32>
    %148 = vector.broadcast %140 : vector<8x1xf32> to vector<8x32xf32>
    %149 = arith.subf %136, %148 : vector<8x32xf32>
    %cst_47 = arith.constant 9.99999974E-6 : f32
    %150 = vector.broadcast %cst_47 : f32 to vector<8x1xf32>
    %151 = arith.addf %147, %150 : vector<8x1xf32>
    %152 = math.rsqrt %151 : vector<8x1xf32>
    %153 = vector.broadcast %152 : vector<8x1xf32> to vector<8x32xf32>
    %154 = arith.mulf %149, %153 : vector<8x32xf32>
    %c0_48 = arith.constant 0 : index
    %c0_49 = arith.constant 0 : index
    %155 = vector.load %arg12[%c0_48, %c0_49] : memref<1x32xf32, #tpu.memory_space<vmem>>, vector<1x32xf32>
    %156 = vector.broadcast %155 : vector<1x32xf32> to vector<8x32xf32>
    %157 = arith.mulf %154, %156 : vector<8x32xf32>
    %c0_50 = arith.constant 0 : index
    %c0_51 = arith.constant 0 : index
    %158 = vector.load %arg13[%c0_50, %c0_51] : memref<1x32xf32, #tpu.memory_space<vmem>>, vector<1x32xf32>
    %159 = vector.broadcast %158 : vector<1x32xf32> to vector<8x32xf32>
    %160 = arith.addf %157, %159 : vector<8x32xf32>
    %161 = arith.truncf %160 : vector<8x32xf32> to vector<8x32xbf16>
    %c0_52 = arith.constant 0 : index
    %c0_53 = arith.constant 0 : index
    %162 = vector.load %arg14[%c0_52, %c0_53] : memref<32x64xbf16, #tpu.memory_space<vmem>>, vector<32x64xbf16>
    %cst_54 = arith.constant dense<0.000000e+00> : vector<8x64xf32>
    %163 = tpu.matmul %161, %162, %cst_54 {dimension_numbers = #tpu.dot_dimension_numbers<[1], [0], [0], [1], [0, 0, 1, 1], [], []>} : vector<8x32xbf16>, vector<32x64xbf16>, vector<8x64xf32> -> vector<8x64xf32>
    %c0_55 = arith.constant 0 : index
    %c0_56 = arith.constant 0 : index
    %164 = vector.load %arg15[%c0_55, %c0_56] : memref<1x64xf32, #tpu.memory_space<vmem>>, vector<1x64xf32>
    %165 = vector.broadcast %164 : vector<1x64xf32> to vector<8x64xf32>
    %166 = arith.addf %163, %165 : vector<8x64xf32>
    %cst_57 = arith.constant 0.000000e+00 : f32
    %167 = vector.broadcast %cst_57 : f32 to vector<8x64xf32>
    %168 = arith.maximumf %166, %167 : vector<8x64xf32>
    %169 = arith.truncf %168 : vector<8x64xf32> to vector<8x64xbf16>
    %c0_58 = arith.constant 0 : index
    %c0_59 = arith.constant 0 : index
    %170 = vector.load %arg16[%c0_58, %c0_59] : memref<64x32xbf16, #tpu.memory_space<vmem>>, vector<64x32xbf16>
    %cst_60 = arith.constant dense<0.000000e+00> : vector<8x32xf32>
    %171 = tpu.matmul %169, %170, %cst_60 {dimension_numbers = #tpu.dot_dimension_numbers<[1], [0], [0], [1], [0, 0, 1, 1], [], []>} : vector<8x64xbf16>, vector<64x32xbf16>, vector<8x32xf32> -> vector<8x32xf32>
    %c0_61 = arith.constant 0 : index
    %c0_62 = arith.constant 0 : index
    %172 = vector.load %arg17[%c0_61, %c0_62] : memref<1x32xf32, #tpu.memory_space<vmem>>, vector<1x32xf32>
    %173 = vector.broadcast %172 : vector<1x32xf32> to vector<8x32xf32>
    %174 = arith.addf %171, %173 : vector<8x32xf32>
    %c0_63 = arith.constant 0 : index
    %c0_64 = arith.constant 0 : index
    %c0_65 = arith.constant 0 : index
    %175 = vector.load %arg18[%c0_63, %c0_64, %c0_65] : memref<1x8x32xf32, #tpu.memory_space<vmem>>, vector<1x8x32xf32>
    %176 = vector.shape_cast %175 : vector<1x8x32xf32> to vector<8x32xf32>
    %177 = vector.shape_cast %174 : vector<8x32xf32> to vector<1x8x32xf32>
    tpu.vector_store %arg18[%c0_63, %c0_64, %c0_65], %177 {strides = array<i32>} : memref<1x8x32xf32, #tpu.memory_space<vmem>>, vector<1x8x32xf32>,
    return
  }
  func.func @transform_0(%arg0: i32, %arg1: i32) -> (i32, i32, i32) {
    %c0_i32 = arith.constant 0 : i32
    %c0_i32_0 = arith.constant 0 : i32
    return %arg0, %arg1, %c0_i32 : i32, i32, i32
  }
  func.func @transform_1(%arg0: i32, %arg1: i32) -> (i32, i32, i32) {
    %c0_i32 = arith.constant 0 : i32
    %c0_i32_0 = arith.constant 0 : i32
    %c0_i32_1 = arith.constant 0 : i32
    return %arg0, %c0_i32, %c0_i32_0 : i32, i32, i32
  }
  func.func @transform_2(%arg0: i32, %arg1: i32) -> (i32, i32) {
    %c0_i32 = arith.constant 0 : i32
    %c0_i32_0 = arith.constant 0 : i32
    %c0_i32_1 = arith.constant 0 : i32
    return %c0_i32, %c0_i32_0 : i32, i32
  }
  func.func @transform_3(%arg0: i32, %arg1: i32) -> (i32, i32) {
    %c0_i32 = arith.constant 0 : i32
    %c0_i32_0 = arith.constant 0 : i32
    %c0_i32_1 = arith.constant 0 : i32
    return %c0_i32, %c0_i32_0 : i32, i32
  }
  func.func @transform_4(%arg0: i32, %arg1: i32) -> (i32, i32) {
    %c0_i32 = arith.constant 0 : i32
    %c0_i32_0 = arith.constant 0 : i32
    %c0_i32_1 = arith.constant 0 : i32
    return %c0_i32, %c0_i32_0 : i32, i32
  }
  func.func @transform_5(%arg0: i32, %arg1: i32) -> (i32, i32) {
    %c0_i32 = arith.constant 0 : i32
    %c0_i32_0 = arith.constant 0 : i32
    %c0_i32_1 = arith.constant 0 : i32
    return %c0_i32, %c0_i32_0 : i32, i32
  }
  func.func @transform_6(%arg0: i32, %arg1: i32) -> (i32, i32) {
    %c0_i32 = arith.constant 0 : i32
    %c0_i32_0 = arith.constant 0 : i32
    %c0_i32_1 = arith.constant 0 : i32
    return %c0_i32, %c0_i32_0 : i32, i32
  }
  func.func @transform_7(%arg0: i32, %arg1: i32) -> (i32, i32) {
    %c0_i32 = arith.constant 0 : i32
    %c0_i32_0 = arith.constant 0 : i32
    %c0_i32_1 = arith.constant 0 : i32
    return %c0_i32, %c0_i32_0 : i32, i32
  }
  func.func @transform_8(%arg0: i32, %arg1: i32) -> (i32, i32) {
    %c0_i32 = arith.constant 0 : i32
    %c0_i32_0 = arith.constant 0 : i32
    %c0_i32_1 = arith.constant 0 : i32
    return %c0_i32, %c0_i32_0 : i32, i32
  }
  func.func @transform_9(%arg0: i32, %arg1: i32) -> (i32, i32) {
    %c0_i32 = arith.constant 0 : i32
    %c0_i32_0 = arith.constant 0 : i32
    %c0_i32_1 = arith.constant 0 : i32
    return %c0_i32, %c0_i32_0 : i32, i32
  }
  func.func @transform_10(%arg0: i32, %arg1: i32) -> (i32, i32) {
    %c0_i32 = arith.constant 0 : i32
    %c0_i32_0 = arith.constant 0 : i32
    %c0_i32_1 = arith.constant 0 : i32
    return %c0_i32, %c0_i32_0 : i32, i32
  }
  func.func @transform_11(%arg0: i32, %arg1: i32) -> (i32, i32) {
    %c0_i32 = arith.constant 0 : i32
    %c0_i32_0 = arith.constant 0 : i32
    %c0_i32_1 = arith.constant 0 : i32
    return %c0_i32, %c0_i32_0 : i32, i32
  }
  func.func @transform_12(%arg0: i32, %arg1: i32) -> (i32, i32) {
    %c0_i32 = arith.constant 0 : i32
    %c0_i32_0 = arith.constant 0 : i32
    %c0_i32_1 = arith.constant 0 : i32
    return %c0_i32, %c0_i32_0 : i32, i32
  }
  func.func @transform_13(%arg0: i32, %arg1: i32) -> (i32, i32) {
    %c0_i32 = arith.constant 0 : i32
    %c0_i32_0 = arith.constant 0 : i32
    %c0_i32_1 = arith.constant 0 : i32
    return %c0_i32, %c0_i32_0 : i32, i32
  }
  func.func @transform_14(%arg0: i32, %arg1: i32) -> (i32, i32) {
    %c0_i32 = arith.constant 0 : i32
    %c0_i32_0 = arith.constant 0 : i32
    %c0_i32_1 = arith.constant 0 : i32
    return %c0_i32, %c0_i32_0 : i32, i32
  }
  func.func @transform_15(%arg0: i32, %arg1: i32) -> (i32, i32) {
    %c0_i32 = arith.constant 0 : i32
    %c0_i32_0 = arith.constant 0 : i32
    %c0_i32_1 = arith.constant 0 : i32
    return %c0_i32, %c0_i32_0 : i32, i32
  }
  func.func @transform_16(%arg0: i32, %arg1: i32) -> (i32, i32, i32) {
    %c0_i32 = arith.constant 0 : i32
    %c0_i32_0 = arith.constant 0 : i32
    return %arg0, %arg1, %c0_i32 : i32, i32, i32
  }
}

</mosaic_0001>

<bundles_post_ra>
// kernel: tpu_custom_call.1
= control target key start
LH: loop header
LB: loop body
LE: loop exit
PB: predicated region body
PF: predicated region fallthrough
CT: control target
= control target key end

     0   :  { %s2153_s0 = inlined_call_operand.vmem [shape: f32[2,8,32], index: 0, kind: input, shape index: {}]   ;;  %s2154_s1 = inlined_call_operand.hbm [shape: bf16[2,8,32], index: 1, kind: input, shape index: {}]   ;;  %s2155_s2 = inlined_call_operand.vmem [shape: bf16[32,32], index: 2, kind: input, shape index: {}]   ;;  %s2156_s3 = inlined_call_operand.vmem [shape: f32[1,32], index: 3, kind: input, shape index: {}]   ;;  %s2157_s4 = inlined_call_operand.vmem [shape: bf16[32,32], index: 4, kind: input, shape index: {}]   ;;  %s2158_s5 = inlined_call_operand.vmem [shape: f32[1,32], index: 5, kind: input, shape index: {}]   ;;  %s2159_s6 = inlined_call_operand.hbm [shape: bf16[32,32], index: 6, kind: input, shape index: {}]   ;;  %s2160_s7 = inlined_call_operand.vmem [shape: f32[1,32], index: 7, kind: input, shape index: {}]   ;;  %s2161_s8 = inlined_call_operand.hbm [shape: bf16[32,32], index: 8, kind: input, shape index: {}]   ;;  %s2162_s9 = inlined_call_operand.vmem [shape: f32[1,32], index: 9, kind: input, shape index: {}]   ;;  %s2163_s10 = inlined_call_operand.vmem [shape: f32[1,32], index: 10, kind: input, shape index: {}]   ;;  %s2164_s11 = inlined_call_operand.vmem [shape: f32[1,32], index: 11, kind: input, shape index: {}]   ;;  %s2165_s12 = inlined_call_operand.hbm [shape: bf16[32,64], index: 12, kind: input, shape index: {}]   ;;  %s2166_s13 = inlined_call_operand.vmem [shape: f32[1,64], index: 13, kind: input, shape index: {}]   ;;  %s2167_s14 = inlined_call_operand.vmem [shape: bf16[64,32], index: 14, kind: input, shape index: {}]   ;;  %s2168_s15 = inlined_call_operand.vmem [shape: f32[1,32], index: 15, kind: input, shape index: {}]   ;;  %s2169_s16 = inlined_call_operand.hbm [shape: f32[2,8,32], index: 16, kind: output, shape index: {}]  }
   0x1   :  { %2174 = sst [smem:[#allocation20_spill]] %s2153_s0 }
   0x2   :  { %2175 = sst [smem:[#allocation21_spill]] %s2154_s1 }
   0x3   :  { %2176 = sst [smem:[#allocation22_spill]] %s2159_s6 }
   0x4   :  { %2177 = sst [smem:[#allocation23_spill]] %s2161_s8 }
   0x5   :  { %2178 = sst [smem:[#allocation24_spill]] %s2164_s11 }
   0x6   :  { %2179 = sst [smem:[#allocation25_spill]] %s2165_s12 }
   0x7   :  { %2180 = sst [smem:[#allocation26_spill]] %s2166_s13 }
   0x8   :  { %2181 = sst [smem:[#allocation27_spill]] %s2168_s15 }
   0x9   :  { %2182 = sst [smem:[#allocation28_spill]] %s2169_s16 }
   0xa   :  { %21 = vsyncpa [#allocation5], 0 }
   0xb   :  { %23 = vsyncpa [#allocation5 + $0x1], 0 }
   0xc   :  { %24 = vsyncpa [#allocation8], 0 }
   0xd   :  { %25 = vsyncpa [#allocation11], 0 }
   0xe   :  { %26 = vsyncpa [#allocation6], 0 }
   0xf   :  { %28 = vsyncpa [#allocation6 + $0x1], 0  ;;  %s1883_s21 = smov 0   ;;  %s1885_s22 = smov 0  }
  0x10   :  { %s1887_s23 = smov 0   ;;  %s1889_s24 = smov 0  }
  0x11   :  { %s1891_s25 = smov 0   ;;  %s1893_s26 = smov 0  }
  0x12 LB: > { %2183 = sst [smem:[#allocation17_spill]] %s1764_s21  ;;  %s2170_s27 = sadd.s32 4294967295, %s1784_s26   ;;  %s1784_s26 = sphi %s1893_s26, %s34_s26   ;;  %s1780_s25 = sphi %s1891_s25, %s2210_s25   ;;  %s1776_s24 = sphi %s1889_s24, %s2209_s24   ;;  %s1772_s23 = sphi %s1887_s23, %s2208_s23   ;;  %s1768_s22 = sphi %s1885_s22, %s2207_s22   ;;  %s1764_s21 = sphi %s1883_s21, %s2206_s21  }
  0x13   : > { %p1334_p0 = scmp.ge.s32.totalorder %s1784_s26, 1  ;;  %p1917_p1 = scmp.eq.s32.totalorder %s2170_s27, 0 }
  0x14   : > { %p427_p2 = scmp.lt.s32.totalorder %s1784_s26, 3  ;;  %s2185_s6 = sld [smem:[#allocation22_spill]] }
  0x15   : > { %s1786_s18 = smov [#allocation7]   ;;  %p1338_p6 = scmp.ge.s32.totalorder %s1784_s26, 2 }
  0x16   : > { %p1925_p3 = pnand %p1334_p0, %p427_p2  ;;  %s452_s19 = sshll.u32 %s1786_s18, 4  ;;  %s453_s19 = int_to_ptr.vmem [resolvable:$true] %s452_s19 }
  0x17   : > { %s2188_s8 = sld [smem:[#allocation23_spill]]  ;;  %s1788_s18 = smov 4  }
  0x18   : > { %p1452_p4 = pneg %p1925_p3  ;;  %s1789_s15 = smov [#allocation9]  }
  0x19   : > { %s469_s16 = sshll.u32 %s1789_s15, 4  ;;  %s2189_s12 = sld [smem:[#allocation25_spill]]  ;;  %s470_s16 = int_to_ptr.vmem [resolvable:$true] %s469_s16 }
  0x1a   : > { %s450_s0 = sshll.u32 %s2185_s6, 4  ;;  %p1933_p5 = pnand %p1452_p4, %p1917_p1  ;;  %s451_s0 = int_to_ptr.hbm [resolvable:$true] %s450_s0 }
  0x1b   : > { %s1787_s6 = smov 64   ;;  %s1790_s30 = smov [#allocation10]  }
  0x1c   : > { %1455 = dma.hbm_to_vmem [thread:$0]  (!%p1933_p5), %s451_s0, 256, %s453_s19, [#allocation8], %s1787_s6, %s1787_s6, %s1788_s18  }
  0x1d   : > { %s467_s27 = sshll.u32 %s2188_s8, 4  ;;  %s492_s8 = sshll.u32 %s1790_s30, 4  ;;  %s468_s27 = int_to_ptr.hbm [resolvable:$true] %s467_s27  ;;  %s493_s8 = int_to_ptr.vmem [resolvable:$true] %s492_s8 }
  0x1e   : > { %1458 = dma.hbm_to_vmem [thread:$0]  (!%p1933_p5), %s468_s27, 256, %s470_s16, [#allocation8], %s1787_s6, %s1787_s6, %s1788_s18  }
  0x1f   : > { %s490_s29 = sshll.u32 %s2189_s12, 4  ;;  %s1333_s0 = sadd.s32 4294967294, %s1784_s26   ;;  %s491_s29 = int_to_ptr.hbm [resolvable:$true] %s490_s29 }
  0x20   : > { %1461 = dma.hbm_to_vmem [thread:$0]  (!%p1933_p5), %s491_s29, 256, %s493_s8, [#allocation11], %s1787_s6, %s1787_s6, %s1788_s18  }
  0x21   : > { %s46_s15 = sadd.s32 1, %s1780_s25  ;;  %s81_s19 = sadd.s32 1, %s1772_s23 }
  0x22   : > { %p48_p7 = scmp.ge.s32.totalorder %s46_s15, 2  ;;  %p88_p8 = scmp.ne.s32.totalorder %s1772_s23, %s1768_s22 }
  0x23   : > { %p89_p9 = scmp.eq.s32.totalorder %s1784_s26, 0  ;;  %p94_p10 = scmp.ne.s32.totalorder %s1768_s22, %s1764_s21 }
  0x24   : > { %s2212_s15 = smov (%p48_p7, %s46_s15), 0  ;;  %s2193_s13 = sadd.s32 4294967295, %s1784_s26  }
  0x25   : > { %2190 = sst [smem:[#allocation18_spill]] %s2212_s15  ;;  %p1960_p11 = por %p89_p9, %p88_p8 }
  0x26   : > { %p1966_p12 = por %p1917_p1, %p94_p10  ;;  %s78_s8 = ssub.s32 %s1780_s25, %s2212_s15 }
  0x27   : > { %p414_p13 = scmp.eq.s32.totalorder %s2193_s13, 1  ;;  %p79_p0 = scmp.eq.s32.totalorder %s78_s8, 0 }
  0x28   : > { %p420_p2 = scmp.eq.s32.totalorder %s1333_s0, 1  ;;  %p1473_p5 = scmp.lt.s32.totalorder %s1784_s26, 2 }
  0x29   : > { %p1974_p4 = por %p414_p13, %p88_p8  ;;  %s525_s18 = sand.u32 1, %s1772_s23  }
  0x2a   : > { %s1980_s27 = scalar_select %p79_p0, %s1772_s23, %s81_s19  }
  0x2b   : > { %p1982_p7 = por %p420_p2, %p94_p10  ;;  %s1339_s29 = sshll.u32 %s525_s18, 2 }
  0x2c   : > { %2195 = sst [smem:[#allocation19_spill]] %s1980_s27  ;;  %s1340_s30 = sshll.u32 %s1780_s25, 2 }
  0x2d   : > { %s2197_s1 = sld [smem:[#allocation21_spill]]  ;;  %s529_s8 = scalar_lea.vmem [#allocation4], %s1339_s29 }
  0x2e   : > { %s537_s0 = sshll.u32 %s529_s8, 4  ;;  %p1463_p8 = pnand %p1473_p5, %p1960_p11  ;;  %s538_s0 = int_to_ptr.vmem [resolvable:$true] %s537_s0 }
  0x2f   : > { %s526_s19 = scalar_lea.sflag [#allocation5], %s525_s18  ;;  %s1996_s27 = sand.u32 (!%p1925_p3), 1, %s1768_s22  }
  0x30   : > { %s1342_s12 = sshll.u32 (!%p1925_p3), %s1996_s27, 2  ;;  %s549_s15 = scalar_lea.sflag (!%p1925_p3), [#allocation5], %s1996_s27 }
  0x31   : > { %546 = sbr.rel (%p1925_p3) target bundleno = 1524 (0x5f4), region = 84  ;;  %s552_s29 = scalar_lea.vmem (!%p1925_p3), [#allocation4], %s1342_s12 }
  0x33   : > { %s533_s13 = scalar_lea.hbm %s2197_s1, %s1340_s30 }
  0x34   : > { %s535_s21 = sshll.u32 %s533_s13, 4  ;;  %s536_s21 = int_to_ptr.hbm [resolvable:$true] %s535_s21 }
  0x35   : > { %1465 = dma.hbm_to_vmem [thread:$0]  (!%p1463_p8), %s536_s21, 64, %s538_s0, %s526_s19  }
  0x36   : > { %1747 = dma.done.wait (%p1966_p12), %s549_s15, 64  }
  0x37   : > { %1749 = vsyncadd (%p1966_p12), %s549_s15, 4294967232 }
  0x38   : > { %1751 = dma.done.wait (%p1917_p1), [#allocation8], 512  }
  0x39   : > { %1753 = vsyncadd (%p1917_p1), [#allocation8], 4294966784 }
  0x3a   : > { %1755 = dma.done.wait (%p1917_p1), [#allocation11], 256  }
  0x3b   : > { %1757 = vsyncadd (%p1917_p1), [#allocation11], 4294967040  ;;  %p624_p3 = scmp.lt.s32.totalorder %s1776_s24, 1  ;;  %s2198_s18 = sld [smem:[#allocation20_spill]]  ;;  %v1423_v0 = vld [vmem:[%s2157_s4 + $0x8] sm:$0xff]  ;;  %v1422_v2 = vld [vmem:[%s2157_s4] sm:$0xff] }
  0x3c   : > { %v1427_v1 = vld [vmem:[%s2155_s2 + $0x8] sm:$0xff]  ;;  %v1426_v3 = vld [vmem:[%s2155_s2] sm:$0xff]  ;;  %668 = vmatpush.bf16.msra.mxu0 %v1423_v0  ;;  %vm658_vm0 = vcmask 261120   ;;  %v1425_v7 = vld [vmem:[#allocation7 + $0x8] sm:$0xff]  ;;  %vm709_vm1 = vcmask 257024   ;;  %vm754_vm2 = vcmask 64512  }
  0x3d   : > { %s625_s21 = scalar_select %p624_p3, %s1776_s24, 1  ;;  %744 = vmatpush.bf16.msra.mxu2 %v1427_v1  ;;  %v637_v6 = vld [vmem:[%s552_s29] sm:$0xf]  ;;  %701 = vmatpush.bf16.msra.mxu1 %v1425_v7  ;;  %v1424_v8 = vld [vmem:[#allocation7] sm:$0xff]  ;;  %v1538_v9 = vld [vmem:[%s2158_s5] ss:$0 sm:$0xff] }
  0x3e   : > { %v1539_v13 = vld [vmem:[%s2156_s3] ss:$0 sm:$0xff]  ;;  %s1791_s11 = smov 112   ;;  %s1792_s6 = smov 120   ;;  %vm792_vm3 = vcmask 1043456   ;;  %vm1018_vm4 = vcmask 130048  }
  0x3f   : > { %s1347_s17 = sshll.u32 %s625_s21, 3  ;;  %v1540_v23 = vld [vmem:[%s2160_s7] ss:$0 sm:$0xff]  ;;  %s1794_s8 = smov 8   ;;  %vm1020_vm5 = vcmask 195584   ;;  %vm1174_vm10 = vcmask 523264  }
  0x40   : > { %669 = vmatpush.bf16.msra.mxu0 %v1422_v2  ;;  %s1795_s0 = smov 16   ;;  %s1796_s19 = smov 24  }
  0x41   : > { %s630_s30 = scalar_lea.vmem %s2198_s18, %s1347_s17  ;;  %745 = vmatpush.bf16.msra.mxu2 %v1426_v3  ;;  %702 = vmatpush.bf16.msra.mxu1 %v1424_v8  ;;  %s1793_s18 = smov 104  }
  0x42   : > { %v2029_v4 = vld [vmem:[%s630_s30] sm:$0xff]  ;;  %s2199_s30 = sld [smem:[#allocation24_spill]]  ;;  %s1419_s1 = sshll.u32 %s1776_s24, 3 }
  0x43   : > { %v713_v5 = vpack.c.bf16 %v2029_v4, %v2029_v4  ;;  %1356 = vmatmul.msk.bf16.vlgmr.msra.gmra.mxu0 %vm658_vm0, %v637_v6  ;;  %s2200_s15 = sld [smem:[#allocation26_spill]]  ;;  %s1346_s21 = sshll.u32 %s1996_s27, 3 }
  0x44   : > { %1365 = vmatmul.msk.bf16.vlgmr.msra.gmra.mxu1 %vm658_vm0, %v637_v6  ;;  %s2202_s13 = sld [smem:[#allocation27_spill]]  ;;  %s1193_s24 = scalar_lea.sflag [#allocation6], %s1996_s27 }
  0x45   : > { %1374 = vmatmul.msk.bf16.vlgmr.msra.gmra.mxu2 %vm658_vm0, %v713_v5 }
  0xc0   : > { %v671_v10 = vpop.f32.mrf.mxu0 }
  0xc1   : > { %v672_v11 = vadd.f32 %v1538_v9, %v671_v10  ;;  %v704_v24 = vpop.f32.mrf.mxu1 }
  0xc2   : > { %v705_v25 = vadd.f32 %v1540_v23, %v704_v24 }
  0xc3   : > { %v708_v12 = vpack.c.bf16 %v672_v11, %v672_v11 }
  0xc4   : > { %v711_v30 = vpack.c.bf16 %v705_v25, %v705_v25 }
  0xc5   : > { %710 = vst.msk [vmem:[#allocation2] sm:$0xf] %vm709_vm1, %v708_v12 }
  0xc6   : > { %712 = vst.msk [vmem:[#allocation3] sm:$0xf] %vm709_vm1, %v711_v30 }
  0xc8   : > { %v747_v14 = vpop.f32.mrf.mxu2  ;;  %v673_v16 = vpop.f32.mrf.mxu0 }
  0xc9   : > { %v748_v15 = vadd.f32 %v1539_v13, %v747_v14  ;;  %v706_v31 = vpop.f32.mrf.mxu1 }
  0xcb   : > { %v751_v17 = vpack.c.bf16 %v748_v15, %v748_v15 }
  0xcc   : > { %v752_v18 = vld [vmem:[#allocation2] sm:$0xf] }
  0xcd   : > { %877 = vrot.lane.b32.xlu2 %v751_v17, %s1791_s11  ;;  %v759_v19 = vsel %vm754_vm2, %v752_v18, 0  ;;  %v814_v20 = vunpack.c.l.b16 %v752_v18  ;;  %v753_v36 = vld [vmem:[#allocation3] sm:$0xf] }
  0xce   : > { %768 = vmatpush.bf16.xpose.msra.mxu3 %v759_v19  ;;  %v794_v37 = vsel %vm792_vm3, %v753_v36, 0  ;;  %v853_v38 = vunpack.c.l.b16 %v753_v36 }
  0xcf   : > { %v815_v22 = vpack.c.b16 %v814_v20, %v814_v20  ;;  %803 = vmatpush.bf16.msrb.mxu0 %v794_v37 }
  0xd0   : > { %v749_v21 = vpop.f32.mrf.mxu2  ;;  %v854_v39 = vpack.c.b16 %v853_v38, %v853_v38 }
  0xd1   : > { %879 = vrot.lane.b32.xlu1 %v815_v22, %s1791_s11  ;;  %816 = vrot.lane.b32.xlu0 %v815_v22, %s1792_s6 }
  0xd5   : > { %937 = vrot.lane.b32.xlu2 %v751_v17, %s1793_s18  ;;  %1375 = vmatmul.msk.bf16.vlgmr.msra.gmra.mxu3 %vm754_vm2, %v751_v17 }
  0xd9   : > { %939 = vrot.lane.b32.xlu1 %v815_v22, %s1793_s18  ;;  %811 = vrot.lane.b32.xlu0 %v751_v17, %s1792_s6 }
  0xdd   : > { %855 = vrot.lane.b32.xlu2 %v854_v39, %s1792_s6 }
 0x127   : > { %v878_v32 = vpop.permute.xlu2 %877 }
 0x12f   : > { %v938_v42 = vpop.permute.xlu2 %937 }
 0x137   : > { %v856_v52 = vpop.permute.xlu2 %855 }
 0x138   : > { %v861_v53 = vsel %vm792_vm3, %v856_v52, 0 }
 0x139   : > { %870 = vmatpush.bf16.msrb.mxu2 %v861_v53 }
 0x143   : > { %v880_v26 = vpop.permute.xlu1 %879  ;;  %v817_v27 = vpop.permute.xlu0 %816 }
 0x144   : > { %v822_v28 = vsel %vm754_vm2, %v817_v27, 0  ;;  %v885_v29 = vsel %vm754_vm2, %v880_v26, 0 }
 0x145   : > { %831 = vmatpush.bf16.xpose.msrb.mxu1 %v822_v28  ;;  %894 = vmatpush.bf16.xpose.msrb.mxu3 %v885_v29 }
 0x14b   : > { %v940_v33 = vpop.permute.xlu1 %939  ;;  %v812_v34 = vpop.permute.xlu0 %811 }
 0x14c   : > { %v945_v35 = vsel %vm754_vm2, %v940_v33, 0  ;;  %1377 = vmatmul.msk.bf16.vlgmr.msrb.gmra.mxu1 %vm754_vm2, %v812_v34  ;;  %1379 = vmatmul.msk.bf16.vlgmr.msrb.gmra.mxu3 %vm754_vm2, %v878_v32 }
 0x14d   : > { %954 = vmatpush.bf16.xpose.msra.mxu1 %v945_v35 }
 0x158   : > { %v770_v40 = vpop.f32.mrf.mxu3 }
 0x159   : > { %v774_v41 = vsel %vm754_vm2, %v770_v40, -inf }
 0x15a   : > { %775 = vmax.xlane.f32.xlu1 %v774_v41 }
 0x15c   : > { %1381 = vmatmul.msk.bf16.vlgmr.msra.gmra.mxu1 %vm754_vm2, %v938_v42 }
 0x160   : > { %v772_v43 = vpop.f32.mrf.mxu3 }
 0x173   : > { %975 = vrot.lane.b32.xlu1 %v854_v39, %s1793_s18 }
 0x1c9   : > { %v833_v44 = vpop.f32.mrf.mxu1 }
 0x1ca   : > { %v837_v45 = vsel %vm754_vm2, %v833_v44, -inf }
 0x1cb   : > { %838 = vmax.xlane.f32.xlu0 %v837_v45 }
 0x1cd   : > { %v776_v46 = vpop.xlane.xlu1 %775 }
 0x1ce   : > { %v780_v47 = vsub.f32 %v770_v40, %v776_v46  ;;  %v777_v63 = vsub.f32 -inf, %v776_v46 }
 0x1cf   : > { %v896_v48 = vpop.f32.mrf.mxu3 }
 0x1d0   : > { %v781_v49 = vmul.f32 1.442695, %v780_v47  ;;  %v900_v51 = vsel %vm754_vm2, %v896_v48, -inf  ;;  %v778_v3 = vmul.f32 1.442695, %v777_v63 }
 0x1d1   : > { %v835_v50 = vpop.f32.mrf.mxu1 }
 0x1d2   : > { %1546 = vpow2.f32 %v781_v49 }
 0x1d3   : > { %901 = vmax.xlane.f32.xlu0 %v900_v51 }
 0x1d7   : > { %v898_v54 = vpop.f32.mrf.mxu3 }
 0x1d8   : > { %v1547_v55 = vpop.eup %1546 }
 0x1d9   : > { %v956_v56 = vpop.f32.mrf.mxu1  ;;  %v784_v57 = vsel %vm754_vm2, %v1547_v55, 0.0  ;;  %v788_v59 = vpack.c.bf16 %v1547_v55, %v1547_v55 }
 0x1da   : > { %v960_v58 = vsel %vm754_vm2, %v956_v56, -inf  ;;  %785 = vadd.xlane.f32.xlu1 %v784_v57 }
 0x1db   : > { %961 = vmax.xlane.f32.xlu2 %v960_v58  ;;  %1376 = vmatmul.msk.bf16.vlgmr.msrb.gmra.mxu0 %vm754_vm2, %v788_v59 }
 0x1e1   : > { %v958_v60 = vpop.f32.mrf.mxu1 }
 0x1e5   : > { %v976_v61 = vpop.permute.xlu1 %975 }
 0x1e6   : > { %v981_v62 = vsel %vm792_vm3, %v976_v61, 0 }
 0x1e7   : > { %990 = vmatpush.bf16.msra.mxu2 %v981_v62 }
 0x1f3   : > { %915 = vrot.lane.b32.xlu2 %v854_v39, %s1791_s11  ;;  %s2201_s11 = sld [smem:[#allocation28_spill]] }
 0x1f9   : > { %s1204_s6 = scalar_lea.hbm %s2201_s11, %s1419_s1 }
 0x23e   : > { %v839_v0 = vpop.xlane.xlu0 %838 }
 0x23f   : > { %v843_v1 = vsub.f32 %v833_v44, %v839_v0  ;;  %v840_v31 = vsub.f32 -inf, %v839_v0  ;;  %v1429_v0 = vld [vmem:[#allocation9 + $0x8] sm:$0xff] }
 0x240   : > { %1052 = vmatpush.bf16.msra.mxu3 %v1429_v0 }
 0x241   : > { %v844_v2 = vmul.f32 1.442695, %v843_v1  ;;  %v841_v32 = vmul.f32 1.442695, %v840_v31  ;;  %v1428_v1 = vld [vmem:[#allocation9] sm:$0xff] }
 0x243   : > { %1548 = vpow2.f32 %v844_v2 }
 0x244   : > { %1550 = vpow2.f32 %v778_v3  ;;  %1053 = vmatpush.bf16.msra.mxu3 %v1428_v1 }
 0x246   : > { %v902_v5 = vpop.xlane.xlu0 %901 }
 0x247   : > { %v906_v6 = vsub.f32 %v896_v48, %v902_v5  ;;  %v903_v33 = vsub.f32 -inf, %v902_v5 }
 0x249   : > { %v907_v7 = vmul.f32 1.442695, %v906_v6  ;;  %v1549_v8 = vpop.eup %1548  ;;  %v904_v34 = vmul.f32 1.442695, %v903_v33 }
 0x24a   : > { %v847_v9 = vsel %vm754_vm2, %v1549_v8, 0.0  ;;  %v851_v10 = vpack.c.bf16 %v1549_v8, %v1549_v8  ;;  %v1551_v11 = vpop.eup %1550 }
 0x24b   : > { %1552 = vpow2.f32 %v907_v7  ;;  %848 = vadd.xlane.f32.xlu0 %v847_v9  ;;  %v783_v14 = vmul.f32 0.0, %v1551_v11 }
 0x24c   : > { %1378 = vmatmul.msk.bf16.vlgmr.msrb.gmra.mxu2 %vm754_vm2, %v851_v10  ;;  %v1541_v10 = vld [vmem:[%s2162_s9] ss:$0 sm:$0xff] }
 0x24d   : > { %v786_v12 = vpop.xlane.xlu1 %785 }
 0x24e   : > { %v962_v13 = vpop.xlane.xlu2 %961  ;;  %v787_v16 = vadd.f32 %v786_v12, %v783_v14 }
 0x24f   : > { %v966_v15 = vsub.f32 %v956_v56, %v962_v13  ;;  %v963_v37 = vsub.f32 -inf, %v962_v13 }
 0x251   : > { %v967_v17 = vmul.f32 1.442695, %v966_v15  ;;  %v1553_v18 = vpop.eup %1552  ;;  %v964_v40 = vmul.f32 1.442695, %v963_v37 }
 0x252   : > { %v910_v19 = vsel %vm754_vm2, %v1553_v18, 0.0  ;;  %v914_v22 = vpack.c.bf16 %v1553_v18, %v1553_v18 }
 0x253   : > { %1554 = vpow2.f32 %v967_v17  ;;  %911 = vadd.xlane.f32.xlu0 %v910_v19 }
 0x254   : > { %1556 = vrcp.f32 %v787_v16  ;;  %v1797_v16 = vmov 32.0  }
 0x255   : > { %1558 = vpow2.f32 %v841_v32  ;;  %v1434_v32 = vld [vmem:[%s2167_s14 + $0x10] sm:$0xff] }
 0x256   : > { %v916_v20 = vpop.permute.xlu2 %915  ;;  %1560 = vpow2.f32 %v904_v34 }
 0x257   : > { %v921_v21 = vsel %vm792_vm3, %v916_v20, 0 }
 0x258   : > { %930 = vmatpush.bf16.msra.mxu0 %v921_v21  ;;  %v805_v23 = vpop.f32.mrf.mxu0 }
 0x259   : > { %v1555_v24 = vpop.eup %1554  ;;  %v809_v25 = vadd.f32 %v805_v23, %v783_v14 }
 0x25a   : > { %v1557_v26 = vpop.eup %1556  ;;  %v974_v27 = vpack.c.bf16 %v1555_v24, %v1555_v24  ;;  %v970_v28 = vsel %vm754_vm2, %v1555_v24, 0.0 }
 0x25b   : > { %1380 = vmatmul.msk.bf16.vlgmr.msra.gmra.mxu0 %vm754_vm2, %v914_v22  ;;  %v998_v29 = vmul.f32 %v1557_v26, %v809_v25  ;;  %971 = vadd.xlane.f32.xlu0 %v970_v28  ;;  %v1559_v36 = vpop.eup %1558  ;;  %v1430_v28 = vld [vmem:[#allocation10] sm:$0xff] }
 0x25c   : > { %1382 = vmatmul.msk.bf16.vlgmr.msra.gmra.mxu2 %vm754_vm2, %v974_v27  ;;  %v846_v38 = vmul.f32 0.0, %v1559_v36  ;;  %v1561_v41 = vpop.eup %1560 }
 0x25d   : > { %v909_v43 = vmul.f32 0.0, %v1561_v41 }
 0x260   : > { %v807_v30 = vpop.f32.mrf.mxu0 }
 0x2be   : > { %v849_v35 = vpop.xlane.xlu0 %848 }
 0x2bf   : > { %v850_v39 = vadd.f32 %v849_v35, %v846_v38 }
 0x2c1   : > { %1562 = vrcp.f32 %v850_v39 }
 0x2c2   : > { %1564 = vpow2.f32 %v964_v40  ;;  %v1542_v40 = vld [vmem:[%s2163_s10] ss:$0 sm:$0xff] }
 0x2c6   : > { %v912_v42 = vpop.xlane.xlu0 %911 }
 0x2c7   : > { %v913_v44 = vadd.f32 %v912_v42, %v909_v43  ;;  %v1563_v47 = vpop.eup %1562 }
 0x2c8   : > { %v1565_v48 = vpop.eup %1564 }
 0x2c9   : > { %1566 = vrcp.f32 %v913_v44  ;;  %v969_v51 = vmul.f32 0.0, %v1565_v48  ;;  %v1432_v48 = vld [vmem:[%s2167_s14] sm:$0xff] }
 0x2ce   : > { %v972_v50 = vpop.xlane.xlu0 %971 }
 0x2cf   : > { %v872_v45 = vpop.f32.mrf.mxu2  ;;  %v973_v52 = vadd.f32 %v972_v50, %v969_v51  ;;  %v1567_v56 = vpop.eup %1566 }
 0x2d0   : > { %v876_v46 = vadd.f32 %v872_v45, %v846_v38 }
 0x2d1   : > { %1568 = vrcp.f32 %v973_v52 }
 0x2d2   : > { %v1000_v49 = vmul.f32 %v1563_v47, %v876_v46  ;;  %1570 = vrcp.f32 %v1797_v16  ;;  %v1433_v47 = vld [vmem:[%s2167_s14 + $0x8] sm:$0xff] }
 0x2d4   : > { %1006 = vrot.lane.b32.xlu2 %v1000_v49, %s1794_s8  ;;  %v1544_v49 = vld [vmem:[%s2200_s15] ss:$0 sm:$0xff]  ;;  %s623_s8 = scalar_lea.vmem [#allocation12], %s1346_s21  ;;  %s1714_s21 = scalar_lea.hbm %s2201_s11, 16 }
 0x2d7   : > { %v874_v53 = vpop.f32.mrf.mxu2  ;;  %v1569_v61 = vpop.eup %1568 }
 0x2d8   : > { %v932_v54 = vpop.f32.mrf.mxu0  ;;  %v1571_v17 = vpop.eup %1570 }
 0x2d9   : > { %v936_v55 = vadd.f32 %v932_v54, %v909_v43  ;;  %v1064_v18 = vmul.f32 32.0, %v1571_v17  ;;  %vm1068_vm6 = vweird.f32 %v1571_v17  ;;  %v1543_v43 = vld [vmem:[%s2199_s30] ss:$0 sm:$0xff] }
 0x2db   : > { %v1002_v57 = vmul.f32 %v1567_v56, %v936_v55  ;;  %v1065_v19 = vsub.f32 1.0, %v1064_v18  ;;  %v1545_v55 = vld [vmem:[%s2202_s13] ss:$0 sm:$0xff] }
 0x2dd   : > { %1010 = vrot.lane.b32.xlu0 %v1002_v57, %s1795_s0  ;;  %v1066_v20 = vmul.f32 %v1571_v17, %v1065_v19  ;;  %s1206_s0 = sshll.u32 %s623_s8, 4  ;;  %s1207_s0 = int_to_ptr.vmem [resolvable:$true] %s1206_s0 }
 0x2df   : > { %v992_v58 = vpop.f32.mrf.mxu2  ;;  %v1067_v21 = vadd.f32 %v1571_v17, %v1066_v20 }
 0x2e0   : > { %v934_v59 = vpop.f32.mrf.mxu0  ;;  %v996_v60 = vadd.f32 %v992_v58, %v969_v51 }
 0x2e1   : > { %v1069_v22 = vsel %vm1068_vm6, %v1571_v17, %v1067_v21 }
 0x2e2   : > { %v1004_v62 = vmul.f32 %v1569_v61, %v996_v60 }
 0x2e4   : > { %1014 = vrot.lane.b32.xlu2 %v1004_v62, %s1796_s19  ;;  %s1208_s19 = sshll.u32 %s1204_s6, 4  ;;  %s1209_s19 = int_to_ptr.hbm [resolvable:$true] %s1208_s19 }
 0x2e5   : > { %s1708_s12 = sshra.s32 %s1209_s19, 4  ;;  %s1709_s12 = int_to_ptr.hbm [resolvable:$true] %s1708_s12 }
 0x2e6   : > { %s1710_s28 = scalar_lea.hbm %s1709_s12, 8  ;;  %p1715_p11 = scmp.lt.s32.totalorder %s1709_s12, %s2201_s11 }
 0x2e7   : > { %v994_v63 = vpop.f32.mrf.mxu2  ;;  %p1711_p1 = scmp.ne.s32.totalorder %s1709_s12, %s1710_s28  ;;  %p1716_p12 = scmp.lt.s32.totalorder %s1714_s21, %s1710_s28 }
 0x2e9   : > { %p1712_p9 = pnand %p1711_p1, %p1974_p4  ;;  %p1717_p13 = por %p1716_p12, %p1715_p11 }
 0x2eb   : > { %p1713_p10 = pneg %p1712_p9 }
 0x2ed   : > { %p1718_p0 = pnand %p1717_p13, %p1713_p10 }
 0x32e   : > { %v1007_v2 = vpop.permute.xlu2 %1006 }
 0x32f   : > { %v1017_v3 = vsel %vm754_vm2, %v998_v29, %v1007_v2  ;;  %v1435_v29 = vld [vmem:[%s2167_s14 + $0x18] sm:$0xff] }
 0x330   : > { %1182 = vmatpush.bf16.msrb.mxu1 %v1435_v29 }
 0x334   : > { %1183 = vmatpush.bf16.msrb.mxu1 %v1434_v32 }
 0x338   : > { %1184 = vmatpush.bf16.msrb.mxu1 %v1433_v47 }
 0x33c   : > { %1185 = vmatpush.bf16.msrb.mxu1 %v1432_v48 }
 0x33e   : > { %v1015_v6 = vpop.permute.xlu2 %1014 }
 0x34f   : > { %v1011_v5 = vpop.permute.xlu0 %1010 }
 0x350   : > { %v1019_v7 = vsel %vm1018_vm4, %v1017_v3, %v1011_v5 }
 0x351   : > { %v1021_v8 = vsel %vm1020_vm5, %v1019_v7, %v1015_v6 }
 0x352   : > { %v1022_v9 = vpack.c.bf16 %v1021_v8, %v1021_v8 }
 0x354   : > { %1391 = vmatmul.msk.bf16.vlgmr.msra.gmra.mxu3 %vm658_vm0, %v1022_v9 }
 0x3d7   : > { %v1055_v11 = vpop.f32.mrf.mxu3 }
 0x3d8   : > { %v1056_v12 = vadd.f32 %v1541_v10, %v1055_v11 }
 0x3da   : > { %v1059_v13 = vadd.f32 %v1056_v12, %v2029_v4  ;;  %v1431_v4 = vld [vmem:[#allocation10 + $0x8] sm:$0xff] }
 0x3db   : > { %1129 = vmatpush.bf16.msrb.mxu0 %v1431_v4 }
 0x3dc   : > { %v1060_v14 = vsel %vm658_vm0, %v1059_v13, 0.0 }
 0x3dd   : > { %1061 = vadd.xlane.f32.xlu2 %v1060_v14 }
 0x3df   : > { %v1057_v15 = vpop.f32.mrf.mxu3  ;;  %1130 = vmatpush.bf16.msrb.mxu0 %v1430_v28 }
 0x450   : > { %v1062_v23 = vpop.xlane.xlu2 %1061 }
 0x451   : > { %v1070_v24 = vmul.f32 %v1069_v22, %v1062_v23 }
 0x453   : > { %v1071_v25 = vsub.f32 %v1059_v13, %v1070_v24 }
 0x455   : > { %v1072_v26 = vmul.f32 %v1071_v25, %v1071_v25 }
 0x457   : > { %v1073_v27 = vsel %vm658_vm0, %v1072_v26, 0.0 }
 0x458   : > { %1074 = vadd.xlane.f32.xlu0 %v1073_v27 }
 0x4cb   : > { %v1075_v30 = vpop.xlane.xlu0 %1074 }
 0x4cc   : > { %v1076_v31 = vmul.f32 %v1075_v30, %v1069_v22 }
 0x4ce   : > { %v1077_v33 = vadd.f32 1e-05, %v1076_v31 }
 0x4d0   : > { %1572 = vrsqrt.f32 %v1077_v33  ;;  %vm1084_vm8 = vweird.f32 %v1077_v33 }
 0x4d6   : > { %v1573_v34 = vpop.eup %1572 }
 0x4d7   : > { %v1079_v35 = vmul.f32 %v1573_v34, %v1077_v33  ;;  %vm1085_vm7 = vweird.f32 %v1573_v34 }
 0x4d8   : > { %vm1086_vm9 = vmor %vm1084_vm8, %vm1085_vm7 }
 0x4d9   : > { %v1080_v36 = vmul.f32 %v1573_v34, %v1079_v35 }
 0x4db   : > { %v1081_v37 = vmul.f32 0.5, %v1080_v36 }
 0x4dd   : > { %v1082_v38 = vsub.f32 1.5, %v1081_v37 }
 0x4df   : > { %v1083_v39 = vmul.f32 %v1573_v34, %v1082_v38 }
 0x4e1   : > { %v1087_v41 = vsel %vm1086_vm9, %v1573_v34, %v1083_v39 }
 0x4e2   : > { %v1088_v42 = vmul.f32 %v1087_v41, %v1071_v25 }
 0x4e4   : > { %v1093_v44 = vmul.f32 %v1542_v40, %v1088_v42 }
 0x4e6   : > { %v1098_v45 = vadd.f32 %v1543_v43, %v1093_v44 }
 0x4e8   : > { %v1099_v46 = vpack.c.bf16 %v1098_v45, %v1098_v45 }
 0x4ea   : > { %1400 = vmatmul.msk.bf16.vlgmr.msrb.gmra.mxu0 %vm658_vm0, %v1099_v46 }
 0x567   : > { %v1132_v50 = vpop.f32.mrf.mxu0 }
 0x568   : > { %v1133_v51 = vadd.f32 %v1544_v49, %v1132_v50 }
 0x56a   : > { %v1136_v52 = vmax.f32 %v1133_v51, 0.0 }
 0x56c   : > { %v1137_v53 = vpack.c.bf16 %v1136_v52, %v1136_v52 }
 0x56e   : > { %1417 = vmatmul.msk.bf16.vlgmr.msrb.gmra.mxu1 %vm1174_vm10, %v1137_v53 }
 0x56f   : > { %v1134_v54 = vpop.f32.mrf.mxu0 }
 0x5eb   : > { %v1187_v56 = vpop.f32.mrf.mxu1 }
 0x5ec   : > { %v1188_v57 = vadd.f32 %v1545_v55, %v1187_v56 }
 0x5ee   : > { %1191 = vst.msk [vmem:[%s623_s8] sm:$0xff] %vm658_vm0, %v1188_v57 }
 0x5ef   : > { %1721 = shalt.err (!%p1718_p0)
}
 0x5f0   : > { %1450 = dma.vmem_to_hbm [thread:$0]  (%p1974_p4), %s1207_s0, 128, %s1209_s19, %s1193_s24  }
 0x5f3   : > { %v1189_v58 = vpop.f32.mrf.mxu1 }
 0x5f4 PF: > { %s2203_s27 = sld [smem:[#allocation17_spill]]  ;;  %p1467_p2 = pnand %p1338_p6, %p1982_p7 }
 0x5f6   : > { %p1468_p5 = pneg %p1467_p2 }
 0x5fa   : > { %s1220_s6 = sand.u32 1, %s2203_s27  }
 0x5fb   : > { %s1221_s18 = scalar_lea.sflag [#allocation6], %s1220_s6 }
 0x5fc   : > { %1759 = dma.done.wait (%p1468_p5), %s1221_s18, 128  }
 0x5fd   : > { %1761 = vsyncadd (%p1468_p5), %s1221_s18, 4294967168  ;;  %s34_s26 = sadd.s32 1, %s1784_s26   ;;  %s2204_s16 = sld [smem:[#allocation19_spill]] }
 0x5fe   : > { %p31_p8 = scmp.ge.s32.totalorder %s34_s26, 4   ;;  %s2205_s30 = sld [smem:[#allocation18_spill]] }
 0x5ff   : > { %s2206_s21 = smov %s1768_s22  ;;  %s2207_s22 = smov %s1772_s23 }
 0x600   : > { %s2209_s24 = smov %s1780_s25  ;;  %33 = sbr.rel (!%p31_p8) target bundleno = 18 (0x12), region = 148 }
 0x603   : > { %s2208_s23 = smov %s2204_s16 }
 0x604   : > { %s2210_s25 = smov %s2205_s30 }
 0x605   :  { %1227 = vsyncpa [#allocation5], 1 }
 0x606   :  { %1229 = vsyncpa [#allocation5 + $0x1], 1 }
 0x607   :  { %1230 = vsyncpa [#allocation8], 1 }
 0x608   :  { %1231 = vsyncpa [#allocation11], 1 }
 0x609   :  { %1232 = vsyncpa [#allocation6], 1 }
 0x60a   :  { %1234 = vsyncpa [#allocation6 + $0x1], 1 }

</bundles_post_ra>
